<compile_context>
chip_gen: v6e
topology: v6e:2x2x1
jax: 0.10.0
libtpu: 0.0.40
codegen_flags: <defaults>
</compile_context>

<pallas_src>
import functools

import jax
import jax.numpy as jnp
from jax.experimental import pallas as pl
from jax.experimental.pallas import tpu as pltpu  # noqa: F401  (kept for future tiled variant)


def _round_up(n, m):
    return ((n + m - 1) // m) * m


def _mlp_kernel(*refs, num_layers):
    # refs = (x, w0, b0, w1, b1, ..., w_{L-1}, b_{L-1}, o)
    x_ref = refs[0]
    o_ref = refs[1 + 2 * num_layers]
    h = x_ref[...]                                        # bf16 (M_pad, K0)
    for i in range(num_layers):
        w = refs[1 + 2 * i][...]                          # bf16 (K_i, N_i)
        b = refs[2 + 2 * i][...]                          # f32  (1,   N_i)
        y = jnp.dot(h.astype(jnp.bfloat16), w,
                    preferred_element_type=jnp.float32)   # MXU, f32 accumulate
        y = y + b                                         # f32 epilogue (VPU)
        if i != num_layers - 1:
            y = jnp.maximum(y, 0.0)                       # ReLU; Dropout(eval) = identity
        h = y
    o_ref[...] = h.astype(o_ref.dtype)


def init_dnn_params(key, input_size, hidden_layers, num_classes, dtype=jnp.float32):
    """Deterministic parameter init (shapes match the nn.Linear layers)."""
    sizes = [input_size] + list(hidden_layers) + [num_classes]
    params = []
    for i, (fin, fout) in enumerate(zip(sizes[:-1], sizes[1:])):
        kw, kb, key = jax.random.split(jax.random.fold_in(key, i), 3)
        bound = 1.0 / jnp.sqrt(jnp.asarray(fin, dtype))
        # Stored as (in_features, out_features): transpose of PyTorch's layout.
        w = jax.random.uniform(kw, (fin, fout), dtype, -bound, bound)
        b = jax.random.uniform(kb, (fout,), dtype, -bound, bound)
        params.append((w, b))
    return params


def dnn_forward(x, params):
    """x: NCHW input (B, C, H, W) -> logits (B, num_classes). Single fused Pallas call."""
    B = x.shape[0]
    x2 = x.reshape(B, -1).astype(jnp.float32)             # x.view(B, -1)
    input_size = x2.shape[1]
    num_layers = len(params)
    num_classes = params[-1][1].shape[0]

    # Pad batch to the sublane tile (>=8) and features to 128-lane multiples.
    m_pad = _round_up(max(B, 8), 8)
    k_pad = _round_up(input_size, 128)

    x_p = jnp.zeros((m_pad, k_pad), jnp.bfloat16)
    x_p = x_p.at[:B, :input_size].set(x2.astype(jnp.bfloat16))

    operands = [x_p]
    in_specs = [pl.BlockSpec(x_p.shape, lambda: (0, 0))]
    flops = 0
    bytes_accessed = x_p.size * 2
    kp = k_pad
    for w, b in params:
        fin, fout = w.shape
        np_ = _round_up(fout, 128)
        w_p = jnp.zeros((kp, np_), jnp.bfloat16).at[:fin, :fout].set(w.astype(jnp.bfloat16))
        b_p = jnp.zeros((1, np_), jnp.float32).at[0, :fout].set(b.astype(jnp.float32))
        operands += [w_p, b_p]
        in_specs += [
            pl.BlockSpec(w_p.shape, lambda: (0, 0)),
            pl.BlockSpec(b_p.shape, lambda: (0, 0)),
        ]
        flops += 2 * m_pad * kp * np_
        bytes_accessed += w_p.size * 2 + b_p.size * 4
        kp = np_

    out_shape = (m_pad, kp)                                # lane-dense (mult of 128) output
    bytes_accessed += out_shape[0] * out_shape[1] * 4

    kernel = functools.partial(_mlp_kernel, num_layers=num_layers)
    out = pl.pallas_call(
        kernel,
        out_shape=jax.ShapeDtypeStruct(out_shape, jnp.float32),
        in_specs=in_specs,
        out_specs=pl.BlockSpec(out_shape, lambda: (0, 0)),
        cost_estimate=pl.CostEstimate(
            flops=flops, transcendentals=0, bytes_accessed=bytes_accessed),
    )(*operands)
    return out[:B, :num_classes]


if __name__ == "__main__":
    key = jax.random.PRNGKey(0)
    kx, kp = jax.random.split(key)

    # Forward-consistent small shapes: flatten(2,4,16,16) -> input_size=1024.
    B, C, H, W = 2, 4, 16, 16
    input_size = C * H * W
    hidden_layers = [128, 64]
    num_classes = 10

    x = jax.random.normal(kx, (B, C, H, W), jnp.float32)
    params = init_dnn_params(kp, input_size, hidden_layers, num_classes)

    fwd = jax.jit(dnn_forward)
    out = jax.block_until_ready(fwd(x, params))
    assert out.shape == (B, num_classes)

    # Pure-JAX reference of the same math (bf16 matmul operands, f32 accumulation).
    ref = x.reshape(B, -1)
    for i, (w, b) in enumerate(params):
        ref = jnp.dot(ref.astype(jnp.bfloat16), w.astype(jnp.bfloat16),
                      preferred_element_type=jnp.float32) + b
        if i != len(params) - 1:
            ref = jnp.maximum(ref, 0.0)
    assert jnp.allclose(out, ref, atol=1e-2, rtol=1e-2), float(jnp.max(jnp.abs(out - ref)))

    print("KERNEL_OK")
</pallas_src>

<mosaic_0001>
module attributes {stable_mosaic.version = 11 : i64} {
  func.func @_mlp_kernel(%arg0: memref<8x1024xbf16, #tpu.memory_space<vmem>>, %arg1: memref<1024x128xbf16, #tpu.memory_space<vmem>>, %arg2: memref<1x128xf32, #tpu.memory_space<vmem>>, %arg3: memref<128x128xbf16, #tpu.memory_space<vmem>>, %arg4: memref<1x128xf32, #tpu.memory_space<vmem>>, %arg5: memref<128x128xbf16, #tpu.memory_space<vmem>>, %arg6: memref<1x128xf32, #tpu.memory_space<vmem>>, %arg7: memref<8x128xf32, #tpu.memory_space<vmem>>) attributes {dimension_semantics = [], scalar_prefetch = 0 : i64, scratch_operands = 0 : i64, tpu.core_type = #tpu.core_type<tc>} {
    %c0 = arith.constant 0 : index
    %c0_0 = arith.constant 0 : index
    %0 = vector.load %arg0[%c0, %c0_0] : memref<8x1024xbf16, #tpu.memory_space<vmem>>, vector<8x1024xbf16>
    %c0_1 = arith.constant 0 : index
    %c0_2 = arith.constant 0 : index
    %1 = vector.load %arg1[%c0_1, %c0_2] : memref<1024x128xbf16, #tpu.memory_space<vmem>>, vector<1024x128xbf16>
    %c0_3 = arith.constant 0 : index
    %c0_4 = arith.constant 0 : index
    %2 = vector.load %arg2[%c0_3, %c0_4] : memref<1x128xf32, #tpu.memory_space<vmem>>, vector<1x128xf32>
    %cst = arith.constant dense<0.000000e+00> : vector<8x128xf32>
    %3 = tpu.matmul %0, %1, %cst {dimension_numbers = #tpu.dot_dimension_numbers<[1], [0], [0], [1], [0, 0, 1, 1], [], []>} : vector<8x1024xbf16>, vector<1024x128xbf16>, vector<8x128xf32> -> vector<8x128xf32>
    %4 = vector.broadcast %2 : vector<1x128xf32> to vector<8x128xf32>
    %5 = arith.addf %3, %4 : vector<8x128xf32>
    %cst_5 = arith.constant 0.000000e+00 : f32
    %6 = vector.broadcast %cst_5 : f32 to vector<8x128xf32>
    %7 = arith.maximumf %5, %6 : vector<8x128xf32>
    %c0_6 = arith.constant 0 : index
    %c0_7 = arith.constant 0 : index
    %8 = vector.load %arg3[%c0_6, %c0_7] : memref<128x128xbf16, #tpu.memory_space<vmem>>, vector<128x128xbf16>
    %c0_8 = arith.constant 0 : index
    %c0_9 = arith.constant 0 : index
    %9 = vector.load %arg4[%c0_8, %c0_9] : memref<1x128xf32, #tpu.memory_space<vmem>>, vector<1x128xf32>
    %10 = arith.truncf %7 : vector<8x128xf32> to vector<8x128xbf16>
    %cst_10 = arith.constant dense<0.000000e+00> : vector<8x128xf32>
    %11 = tpu.matmul %10, %8, %cst_10 {dimension_numbers = #tpu.dot_dimension_numbers<[1], [0], [0], [1], [0, 0, 1, 1], [], []>} : vector<8x128xbf16>, vector<128x128xbf16>, vector<8x128xf32> -> vector<8x128xf32>
    %12 = vector.broadcast %9 : vector<1x128xf32> to vector<8x128xf32>
    %13 = arith.addf %11, %12 : vector<8x128xf32>
    %cst_11 = arith.constant 0.000000e+00 : f32
    %14 = vector.broadcast %cst_11 : f32 to vector<8x128xf32>
    %15 = arith.maximumf %13, %14 : vector<8x128xf32>
    %c0_12 = arith.constant 0 : index
    %c0_13 = arith.constant 0 : index
    %16 = vector.load %arg5[%c0_12, %c0_13] : memref<128x128xbf16, #tpu.memory_space<vmem>>, vector<128x128xbf16>
    %c0_14 = arith.constant 0 : index
    %c0_15 = arith.constant 0 : index
    %17 = vector.load %arg6[%c0_14, %c0_15] : memref<1x128xf32, #tpu.memory_space<vmem>>, vector<1x128xf32>
    %18 = arith.truncf %15 : vector<8x128xf32> to vector<8x128xbf16>
    %cst_16 = arith.constant dense<0.000000e+00> : vector<8x128xf32>
    %19 = tpu.matmul %18, %16, %cst_16 {dimension_numbers = #tpu.dot_dimension_numbers<[1], [0], [0], [1], [0, 0, 1, 1], [], []>} : vector<8x128xbf16>, vector<128x128xbf16>, vector<8x128xf32> -> vector<8x128xf32>
    %20 = vector.broadcast %17 : vector<1x128xf32> to vector<8x128xf32>
    %21 = arith.addf %19, %20 : vector<8x128xf32>
    %c0_17 = arith.constant 0 : index
    %c0_18 = arith.constant 0 : index
    %22 = vector.load %arg7[%c0_17, %c0_18] : memref<8x128xf32, #tpu.memory_space<vmem>>, vector<8x128xf32>
    tpu.vector_store %arg7[%c0_17, %c0_18], %21 {strides = array<i32>} : memref<8x128xf32, #tpu.memory_space<vmem>>, vector<8x128xf32>,
    return
  }
}

</mosaic_0001>

<bundles_post_ra>
// kernel: dnn_forward.1
= control target key start
LH: loop header
LB: loop body
LE: loop exit
PB: predicated region body
PF: predicated region fallthrough
CT: control target
= control target key end

     0   :  { %vm1297_vm0 = vmmov 0   ;;  %s1620_s1 = inlined_call_operand.vmem [shape: bf16[1024,128], index: 1, kind: input, shape index: {}]   ;;  %s1621_s0 = inlined_call_operand.vmem [shape: bf16[8,1024], index: 0, kind: input, shape index: {}]   ;;  %s1622_s3 = inlined_call_operand.vmem [shape: bf16[128,128], index: 3, kind: input, shape index: {}]   ;;  %s1623_s5 = inlined_call_operand.vmem [shape: bf16[128,128], index: 5, kind: input, shape index: {}]   ;;  %s1624_s2 = inlined_call_operand.vmem [shape: f32[1,128], index: 2, kind: input, shape index: {}]   ;;  %s1625_s4 = inlined_call_operand.vmem [shape: f32[1,128], index: 4, kind: input, shape index: {}]   ;;  %s1626_s6 = inlined_call_operand.vmem [shape: f32[1,128], index: 6, kind: input, shape index: {}]   ;;  %s1627_s7 = inlined_call_operand.vmem [shape: f32[8,128], index: 7, kind: output, shape index: {}]  }
   0x1   :  { %v1208_v0 = vld [vmem:[%s1620_s1 + $0x78] sm:$0xff]   ;;  %v1212_v4 = vld [vmem:[%s1620_s1 + $0x70] sm:$0xff]   ;;  %v1216_v8 = vld [vmem:[%s1620_s1 + $0x68] sm:$0xff]  }
   0x2   :  { %v1209_v1 = vld [vmem:[%s1620_s1 + $0xf8] sm:$0xff]   ;;  %1060 = vmatprep.subr.bf16.mxu0 %v1208_v0  ;;  %v1213_v5 = vld [vmem:[%s1620_s1 + $0xf0] sm:$0xff]   ;;  %v1217_v9 = vld [vmem:[%s1620_s1 + $0xe8] sm:$0xff]  }
   0x3   :  { %v1210_v2 = vld [vmem:[%s1620_s1 + $0x38] sm:$0xff]   ;;  %1082 = vmatprep.subr.bf16.mxu1 %v1209_v1  ;;  %v1214_v6 = vld [vmem:[%s1620_s1 + $0x30] sm:$0xff]   ;;  %v1218_v10 = vld [vmem:[%s1620_s1 + $0x28] sm:$0xff]  }
   0x4   :  { %v1211_v3 = vld [vmem:[%s1620_s1 + $0xb8] sm:$0xff]   ;;  %1061 = vmatpush3.bf16.msra.mxu0 %v1210_v2  ;;  %v1215_v7 = vld [vmem:[%s1620_s1 + $0xb0] sm:$0xff]   ;;  %v1219_v11 = vld [vmem:[%s1620_s1 + $0xa8] sm:$0xff]  }
   0x5   :  { %1083 = vmatpush3.bf16.msra.mxu1 %v1211_v3  ;;  %1062 = vmatprep.subr.bf16.mxu0 %v1212_v4  ;;  %v1220_v12 = vld [vmem:[%s1620_s1 + $0x60] sm:$0xff]   ;;  %v1224_v16 = vld [vmem:[%s1620_s1 + $0x58] sm:$0xff]   ;;  %v1228_v20 = vld [vmem:[%s1620_s1 + $0x50] sm:$0xff]  }
   0x6   :  { %1084 = vmatprep.subr.bf16.mxu1 %v1213_v5  ;;  %v1221_v13 = vld [vmem:[%s1620_s1 + $0xe0] sm:$0xff]   ;;  %v1225_v17 = vld [vmem:[%s1620_s1 + $0xd8] sm:$0xff]   ;;  %v1229_v21 = vld [vmem:[%s1620_s1 + $0xd0] sm:$0xff]  }
   0x7   :  { %v1222_v14 = vld [vmem:[%s1620_s1 + $0x20] sm:$0xff]   ;;  %v1226_v18 = vld [vmem:[%s1620_s1 + $0x18] sm:$0xff]   ;;  %v1230_v22 = vld [vmem:[%s1620_s1 + $0x10] sm:$0xff]  }
   0x8   :  { %1063 = vmatpush3.bf16.msra.mxu0 %v1214_v6  ;;  %v1223_v15 = vld [vmem:[%s1620_s1 + $0xa0] sm:$0xff]   ;;  %v1227_v19 = vld [vmem:[%s1620_s1 + $0x98] sm:$0xff]   ;;  %v1231_v23 = vld [vmem:[%s1620_s1 + $0x90] sm:$0xff]  }
   0x9   :  { %1085 = vmatpush3.bf16.msra.mxu1 %v1215_v7  ;;  %1064 = vmatprep.subr.bf16.mxu0 %v1216_v8  ;;  %v1232_v24 = vld [vmem:[%s1620_s1 + $0x48] sm:$0xff]   ;;  %v1236_v28 = vld [vmem:[%s1620_s1 + $0x40] sm:$0xff]   ;;  %v1244_v38 = vld [vmem:[%s1620_s1 + $0x178] sm:$0xff]  }
   0xa   :  { %1086 = vmatprep.subr.bf16.mxu1 %v1217_v9  ;;  %v1233_v25 = vld [vmem:[%s1620_s1 + $0xc8] sm:$0xff]   ;;  %v1237_v29 = vld [vmem:[%s1620_s1 + $0xc0] sm:$0xff]   ;;  %v1245_v39 = vld [vmem:[%s1620_s1 + $0x1f8] sm:$0xff]  }
   0xb   :  { %v1234_v26 = vld [vmem:[%s1620_s1 + $0x8] sm:$0xff]   ;;  %v1238_v30 = vld [vmem:[%s1620_s1] sm:$0xff]   ;;  %v1246_v40 = vld [vmem:[%s1620_s1 + $0x138] sm:$0xff]  }
   0xc   :  { %1065 = vmatpush3.bf16.msra.mxu0 %v1218_v10  ;;  %v1235_v27 = vld [vmem:[%s1620_s1 + $0x88] sm:$0xff]   ;;  %v1239_v31 = vld [vmem:[%s1620_s1 + $0x80] sm:$0xff]   ;;  %v1247_v41 = vld [vmem:[%s1620_s1 + $0x1b8] sm:$0xff]  }
   0xd   :  { %1087 = vmatpush3.bf16.msra.mxu1 %v1219_v11  ;;  %1066 = vmatprep.subr.bf16.mxu0 %v1220_v12  ;;  %v27_v32 = vld [vmem:[%s1621_s0] sm:$0xff]  ;;  %v28_v33 = vld [vmem:[%s1621_s0 + $0x8] sm:$0xff]  ;;  %v1248_v42 = vld [vmem:[%s1620_s1 + $0x170] sm:$0xff]   ;;  %v1296_v12 = vmov 0.0  }
   0xe   :  { %1088 = vmatprep.subr.bf16.mxu1 %v1221_v13  ;;  %v970_v34 = vcombine.low %v27_v32, %v27_v32  ;;  %v971_v35 = vcombine.high %v27_v32, %v27_v32  ;;  %v972_v36 = vcombine.low %v28_v33, %v28_v33  ;;  %v973_v37 = vcombine.high %v28_v33, %v28_v33  ;;  %v1249_v43 = vld [vmem:[%s1620_s1 + $0x1f0] sm:$0xff]   ;;  %v1252_v46 = vld [vmem:[%s1620_s1 + $0x168] sm:$0xff]   ;;  %v1256_v50 = vld [vmem:[%s1620_s1 + $0x160] sm:$0xff]  }
   0xf   :  { %v1250_v44 = vld [vmem:[%s1620_s1 + $0x130] sm:$0xff]   ;;  %v1253_v47 = vld [vmem:[%s1620_s1 + $0x1e8] sm:$0xff]   ;;  %v1257_v51 = vld [vmem:[%s1620_s1 + $0x1e0] sm:$0xff]  }
  0x10   :  { %1067 = vmatpush3.bf16.msra.mxu0 %v1222_v14  ;;  %610 = vmatprep.mubr.bf16.mxu0 %v971_v35  ;;  %v1251_v45 = vld [vmem:[%s1620_s1 + $0x1b0] sm:$0xff]   ;;  %v1254_v48 = vld [vmem:[%s1620_s1 + $0x128] sm:$0xff]   ;;  %v1258_v52 = vld [vmem:[%s1620_s1 + $0x120] sm:$0xff]  }
  0x11   :  { %1089 = vmatpush3.bf16.msra.mxu1 %v1223_v15  ;;  %1068 = vmatprep.subr.bf16.mxu0 %v1224_v16  ;;  %v1255_v49 = vld [vmem:[%s1620_s1 + $0x1a8] sm:$0xff]   ;;  %v1259_v53 = vld [vmem:[%s1620_s1 + $0x1a0] sm:$0xff]   ;;  %v1260_v54 = vld [vmem:[%s1620_s1 + $0x158] sm:$0xff]  }
  0x12   :  { %1090 = vmatprep.subr.bf16.mxu1 %v1225_v17  ;;  %650 = vmatprep.mubr.bf16.mxu1 %v973_v37  ;;  %v1261_v55 = vld [vmem:[%s1620_s1 + $0x1d8] sm:$0xff]   ;;  %v1264_v58 = vld [vmem:[%s1620_s1 + $0x150] sm:$0xff]   ;;  %v1268_v62 = vld [vmem:[%s1620_s1 + $0x148] sm:$0xff]  }
  0x13   :  { %v1262_v56 = vld [vmem:[%s1620_s1 + $0x118] sm:$0xff]   ;;  %v1265_v59 = vld [vmem:[%s1620_s1 + $0x1d0] sm:$0xff]   ;;  %v1269_v63 = vld [vmem:[%s1620_s1 + $0x1c8] sm:$0xff]  }
  0x14   :  { %1069 = vmatpush3.bf16.msra.mxu0 %v1226_v18  ;;  %v1263_v57 = vld [vmem:[%s1620_s1 + $0x198] sm:$0xff]   ;;  %v1266_v60 = vld [vmem:[%s1620_s1 + $0x110] sm:$0xff]   ;;  %v1270_v0 = vld [vmem:[%s1620_s1 + $0x108] sm:$0xff]  }
  0x15   :  { %1091 = vmatpush3.bf16.msra.mxu1 %v1227_v19  ;;  %1070 = vmatprep.subr.bf16.mxu0 %v1228_v20  ;;  %v1267_v61 = vld [vmem:[%s1620_s1 + $0x190] sm:$0xff]   ;;  %v1271_v1 = vld [vmem:[%s1620_s1 + $0x188] sm:$0xff]   ;;  %v1272_v2 = vld [vmem:[%s1620_s1 + $0x140] sm:$0xff]  }
  0x16   :  { %1092 = vmatprep.subr.bf16.mxu1 %v1229_v21  ;;  %v1273_v3 = vld [vmem:[%s1620_s1 + $0x1c0] sm:$0xff]   ;;  %v29_v6 = vld [vmem:[%s1621_s0 + $0x10] sm:$0xff]  ;;  %v30_v9 = vld [vmem:[%s1621_s0 + $0x18] sm:$0xff] }
  0x17   :  { %v1274_v4 = vld [vmem:[%s1620_s1 + $0x100] sm:$0xff]   ;;  %v974_v7 = vcombine.low %v29_v6, %v29_v6  ;;  %v975_v8 = vcombine.high %v29_v6, %v29_v6  ;;  %v976_v10 = vcombine.low %v30_v9, %v30_v9  ;;  %v977_v11 = vcombine.high %v30_v9, %v30_v9  ;;  %v1280_v13 = vld [vmem:[%s1622_s3 + $0x38] sm:$0xff]   ;;  %v1281_v14 = vld [vmem:[%s1622_s3 + $0x30] sm:$0xff]  }
  0x18   :  { %1071 = vmatpush3.bf16.msra.mxu0 %v1230_v22  ;;  %v1275_v5 = vld [vmem:[%s1620_s1 + $0x180] sm:$0xff]   ;;  %v1282_v15 = vld [vmem:[%s1622_s3 + $0x28] sm:$0xff]   ;;  %v1284_v17 = vld [vmem:[%s1622_s3 + $0x18] sm:$0xff]  }
  0x19   :  { %1093 = vmatpush3.bf16.msra.mxu1 %v1231_v23  ;;  %1072 = vmatprep.subr.bf16.mxu0 %v1232_v24  ;;  %v1283_v16 = vld [vmem:[%s1622_s3 + $0x20] sm:$0xff]   ;;  %v1285_v18 = vld [vmem:[%s1622_s3 + $0x10] sm:$0xff]   ;;  %v1286_v19 = vld [vmem:[%s1622_s3 + $0x8] sm:$0xff]  }
  0x1a   :  { %1094 = vmatprep.subr.bf16.mxu1 %v1233_v25  ;;  %v1287_v20 = vld [vmem:[%s1622_s3] sm:$0xff]   ;;  %v1288_v21 = vld [vmem:[%s1623_s5 + $0x38] sm:$0xff]   ;;  %v1289_v22 = vld [vmem:[%s1623_s5 + $0x30] sm:$0xff]  }
  0x1b   :  { %v1290_v23 = vld [vmem:[%s1623_s5 + $0x28] sm:$0xff]   ;;  %v1291_v24 = vld [vmem:[%s1623_s5 + $0x20] sm:$0xff]   ;;  %v1292_v25 = vld [vmem:[%s1623_s5 + $0x18] sm:$0xff]  }
  0x1c   :  { %1073 = vmatpush3.bf16.msra.mxu0 %v1234_v26  ;;  %v1293_v26 = vld [vmem:[%s1623_s5 + $0x10] sm:$0xff]  }
  0x1d   :  { %1095 = vmatpush3.bf16.msra.mxu1 %v1235_v27  ;;  %1074 = vmatprep.subr.bf16.mxu0 %v1236_v28 }
  0x1e   :  { %1096 = vmatprep.subr.bf16.mxu1 %v1237_v29 }
  0x20   :  { %1075 = vmatpush3.bf16.msra.mxu0 %v1238_v30 }
  0x21   :  { %1097 = vmatpush3.bf16.msra.mxu1 %v1239_v31  ;;  %1104 = vmatprep.subr.bf16.mxu0 %v1244_v38 }
  0x22   :  { %1126 = vmatprep.subr.bf16.mxu1 %v1245_v39 }
  0x23   :  { %611 = vmatmul.mubr.bf16.vlgmr.msra.gmra.mxu0 %v970_v34 }
  0x24   :  { %651 = vmatmul.mubr.bf16.vlgmr.msra.gmra.mxu1 %v972_v36  ;;  %1105 = vmatpush3.bf16.msra.mxu0 %v1246_v40  ;;  %v969_v36 = vld [vmem:[%s1624_s2] ss:$0 sm:$0xff] }
  0x25   :  { %1127 = vmatpush3.bf16.msra.mxu1 %v1247_v41  ;;  %1106 = vmatprep.subr.bf16.mxu0 %v1248_v42 }
  0x26   :  { %1128 = vmatprep.subr.bf16.mxu1 %v1249_v43  ;;  %690 = vmatprep.mubr.bf16.mxu0 %v975_v8 }
  0x27   :  { %730 = vmatprep.mubr.bf16.mxu1 %v977_v11 }
  0x28   :  { %1107 = vmatpush3.bf16.msra.mxu0 %v1250_v44 }
  0x29   :  { %1129 = vmatpush3.bf16.msra.mxu1 %v1251_v45  ;;  %1108 = vmatprep.subr.bf16.mxu0 %v1252_v46 }
  0x2a   :  { %1130 = vmatprep.subr.bf16.mxu1 %v1253_v47 }
  0x2c   :  { %1109 = vmatpush3.bf16.msra.mxu0 %v1254_v48 }
  0x2d   :  { %1131 = vmatpush3.bf16.msra.mxu1 %v1255_v49  ;;  %1110 = vmatprep.subr.bf16.mxu0 %v1256_v50 }
  0x2e   :  { %1132 = vmatprep.subr.bf16.mxu1 %v1257_v51 }
  0x30   :  { %1111 = vmatpush3.bf16.msra.mxu0 %v1258_v52 }
  0x31   :  { %1133 = vmatpush3.bf16.msra.mxu1 %v1259_v53  ;;  %1112 = vmatprep.subr.bf16.mxu0 %v1260_v54  ;;  %v1294_v54 = vld [vmem:[%s1623_s5 + $0x8] sm:$0xff]  }
  0x32   :  { %1134 = vmatprep.subr.bf16.mxu1 %v1261_v55  ;;  %v1295_v55 = vld [vmem:[%s1623_s5] sm:$0xff]  }
  0x34   :  { %1113 = vmatpush3.bf16.msra.mxu0 %v1262_v56  ;;  %v1042_v56 = vld [vmem:[%s1625_s4] ss:$0 sm:$0xff] }
  0x35   :  { %1135 = vmatpush3.bf16.msra.mxu1 %v1263_v57  ;;  %1114 = vmatprep.subr.bf16.mxu0 %v1264_v58 }
  0x36   :  { %1136 = vmatprep.subr.bf16.mxu1 %v1265_v59 }
  0x38   :  { %1115 = vmatpush3.bf16.msra.mxu0 %v1266_v60 }
  0x39   :  { %1137 = vmatpush3.bf16.msra.mxu1 %v1267_v61  ;;  %1116 = vmatprep.subr.bf16.mxu0 %v1268_v62 }
  0x3a   :  { %1138 = vmatprep.subr.bf16.mxu1 %v1269_v63 }
  0x3c   :  { %1117 = vmatpush3.bf16.msra.mxu0 %v1270_v0  ;;  %v1051_v0 = vld [vmem:[%s1626_s6] ss:$0 sm:$0xff] }
  0x3d   :  { %1139 = vmatpush3.bf16.msra.mxu1 %v1271_v1  ;;  %1118 = vmatprep.subr.bf16.mxu0 %v1272_v2 }
  0x3e   :  { %1140 = vmatprep.subr.bf16.mxu1 %v1273_v3 }
  0x40   :  { %1119 = vmatpush3.bf16.msra.mxu0 %v1274_v4 }
  0x41   :  { %1141 = vmatpush3.bf16.msra.mxu1 %v1275_v5  ;;  %1166 = vmatprep.subr.bf16.mxu0 %v1296_v12 }
  0x42   :  { %1186 = vmatprep.subr.bf16.mxu1 %v1296_v12 }
  0x43   :  { %691 = vmatmul.mubr.bf16.vlgmr.msra.gmra.mxu0 %v974_v7 }
  0x44   :  { %731 = vmatmul.mubr.bf16.vlgmr.msra.gmra.mxu1 %v976_v10  ;;  %1167 = vmatpush3.bf16.msra.mxu0 %v1280_v13 }
  0x45   :  { %1168 = vmatprep.subr.bf16.mxu0 %v1296_v12  ;;  %1182 = vmatprep.mubr.msk.bf16.mxu0 %vm1297_vm0, %v1296_v12 }
  0x46   :  { %1202 = vmatprep.mubr.msk.bf16.mxu1 %vm1297_vm0, %v1296_v12  ;;  %1187 = vmatpush3.bf16.msra.mxu1 %v1288_v21 }
  0x47   :  { %1188 = vmatprep.subr.bf16.mxu1 %v1296_v12 }
  0x48   :  { %1169 = vmatpush3.bf16.msra.mxu0 %v1281_v14 }
  0x49   :  { %1170 = vmatprep.subr.bf16.mxu0 %v1296_v12 }
  0x4a   :  { %1189 = vmatpush3.bf16.msra.mxu1 %v1289_v22 }
  0x4b   :  { %1190 = vmatprep.subr.bf16.mxu1 %v1296_v12 }
  0x4c   :  { %1171 = vmatpush3.bf16.msra.mxu0 %v1282_v15 }
  0x4d   :  { %1172 = vmatprep.subr.bf16.mxu0 %v1296_v12 }
  0x4e   :  { %1191 = vmatpush3.bf16.msra.mxu1 %v1290_v23 }
  0x4f   :  { %1192 = vmatprep.subr.bf16.mxu1 %v1296_v12 }
  0x50   :  { %1173 = vmatpush3.bf16.msra.mxu0 %v1283_v16 }
  0x51   :  { %1174 = vmatprep.subr.bf16.mxu0 %v1296_v12 }
  0x52   :  { %1193 = vmatpush3.bf16.msra.mxu1 %v1291_v24 }
  0x53   :  { %1194 = vmatprep.subr.bf16.mxu1 %v1296_v12 }
  0x54   :  { %1175 = vmatpush3.bf16.msra.mxu0 %v1284_v17 }
  0x55   :  { %1176 = vmatprep.subr.bf16.mxu0 %v1296_v12 }
  0x56   :  { %1195 = vmatpush3.bf16.msra.mxu1 %v1292_v25 }
  0x57   :  { %1196 = vmatprep.subr.bf16.mxu1 %v1296_v12 }
  0x58   :  { %1177 = vmatpush3.bf16.msra.mxu0 %v1285_v18 }
  0x59   :  { %1178 = vmatprep.subr.bf16.mxu0 %v1296_v12 }
  0x5a   :  { %1197 = vmatpush3.bf16.msra.mxu1 %v1293_v26 }
  0x5b   :  { %1198 = vmatprep.subr.bf16.mxu1 %v1296_v12 }
  0x5c   :  { %1179 = vmatpush3.bf16.msra.mxu0 %v1286_v19 }
  0x5d   :  { %1180 = vmatprep.subr.bf16.mxu0 %v1296_v12 }
  0x5e   :  { %1199 = vmatpush3.bf16.msra.mxu1 %v1294_v54 }
  0x5f   :  { %1200 = vmatprep.subr.bf16.mxu1 %v1296_v12 }
  0x60   :  { %1181 = vmatpush3.bf16.msra.mxu0 %v1287_v20 }
  0x62   :  { %1201 = vmatpush3.bf16.msra.mxu1 %v1295_v55 }
  0xe3   :  { %v1076_v27 = vpop.f32.mrf.mxu0 }
  0xe4   :  { %v1098_v28 = vpop.f32.mrf.mxu1 }
  0xe5   :  { %v1077_v29 = vpop.f32.mrf.mxu0 }
  0xe6   :  { %v1099_v30 = vpop.f32.mrf.mxu1  ;;  %v1078_v35 = vadd.f32 %v1077_v29, %v1076_v27 }
  0xe7   :  { %v1079_v31 = vpop.f32.mrf.mxu0  ;;  %v1100_v38 = vadd.f32 %v1099_v30, %v1098_v28 }
  0xe8   :  { %v1101_v32 = vpop.f32.mrf.mxu1  ;;  %v613_v37 = vadd.f32 %v1078_v35, %v969_v36 }
  0xe9   :  { %v1080_v33 = vpop.f32.mrf.mxu0 }
  0xea   :  { %v1102_v34 = vpop.f32.mrf.mxu1  ;;  %v653_v43 = vadd.f32 %v1100_v38, %v613_v37 }
 0x103   :  { %v1120_v39 = vpop.f32.mrf.mxu0 }
 0x104   :  { %v1142_v40 = vpop.f32.mrf.mxu1 }
 0x105   :  { %v1121_v41 = vpop.f32.mrf.mxu0 }
 0x106   :  { %v1143_v42 = vpop.f32.mrf.mxu1  ;;  %v1122_v44 = vadd.f32 %v1121_v41, %v1120_v39 }
 0x107   :  { %v1123_v45 = vpop.f32.mrf.mxu0  ;;  %v1144_v48 = vadd.f32 %v1143_v42, %v1142_v40 }
 0x108   :  { %v1145_v46 = vpop.f32.mrf.mxu1  ;;  %v693_v47 = vadd.f32 %v1122_v44, %v653_v43 }
 0x109   :  { %v1124_v49 = vpop.f32.mrf.mxu0 }
 0x10a   :  { %v1146_v50 = vpop.f32.mrf.mxu1  ;;  %v733_v51 = vadd.f32 %v1144_v48, %v693_v47 }
 0x10c   :  { %v738_v52 = vmax.f32 %v733_v51, 0.0 }
 0x10e   :  { %v756_v53 = vpack.c.bf16 %v738_v52, %v738_v52 }
 0x110   :  { %1183 = vmatmul.mubr.bf16.vlgmr.msra.gmra.mxu0 %v756_v53 }
 0x1d0   :  { %v845_v57 = vpop.f32.mrf.mxu0 }
 0x1d1   :  { %v846_v58 = vadd.f32 %v1042_v56, %v845_v57 }
 0x1d2   :  { %v1184_v59 = vpop.f32.mrf.mxu0 }
 0x1d3   :  { %v851_v60 = vmax.f32 %v846_v58, 0.0 }
 0x1d4   :  { %v848_v61 = vpop.f32.mrf.mxu0 }
 0x1d5   :  { %v869_v62 = vpack.c.bf16 %v851_v60, %v851_v60 }
 0x1d6   :  { %v1185_v63 = vpop.f32.mrf.mxu0 }
 0x1d7   :  { %1203 = vmatmul.mubr.bf16.vlgmr.msra.gmra.mxu1 %v869_v62 }
 0x297   :  { %v958_v1 = vpop.f32.mrf.mxu1 }
 0x298   :  { %v959_v2 = vadd.f32 %v1051_v0, %v958_v1 }
 0x299   :  { %v1204_v3 = vpop.f32.mrf.mxu1 }
 0x29a   :  { %964 = vst [vmem:[%s1627_s7] sm:$0xff] %v959_v2 }
 0x29b   :  { %v961_v4 = vpop.f32.mrf.mxu1 }
 0x29d   :  { %v1205_v5 = vpop.f32.mrf.mxu1 }

</bundles_post_ra>
